<compile_context>
chip_gen: v6e
topology: v6e:2x2x1
jax: 0.10.0
libtpu: 0.0.40
codegen_flags: <defaults>
</compile_context>

<pallas_src>
import functools

import jax
import jax.numpy as jnp
from jax import lax
from jax.experimental import pallas as pl
from jax.experimental.pallas import tpu as pltpu

EPS = 1e-12  # F.normalize default eps (clamp_min on the norm)


def _netvlad_kernel(x_ref, w_ref, c_ref, out_ref, *, batch_tile, mxu_dtype):
    # x_ref:   (B, C, S)  native NCHW-flattened layout (spatial on lanes)
    # w_ref:   (K, C)     1x1-conv weight (no bias, vladv2=False)
    # c_ref:   (K, C)     centroids
    # out_ref: (B, K, C)  fully-normalized VLAD descriptors (pre-flatten)
    w = w_ref[...].astype(jnp.float32)            # (K, C)
    cent = c_ref[...].astype(jnp.float32)         # (K, C)
    w_m = w.astype(mxu_dtype)                     # MXU-feed dtype (hoisted)

    def body(b, carry):
        x_b = x_ref[b].astype(jnp.float32)                        # (C, S)

        # descriptor-wise L2 normalization over channels (sublane reduce)
        sq = jnp.sum(x_b * x_b, axis=0, keepdims=True)            # (1, S)
        x_b = x_b * lax.rsqrt(jnp.maximum(sq, EPS * EPS))         # == x/max(||x||,EPS)
        x_m = x_b.astype(mxu_dtype)

        # 1x1 conv soft-assignment: one MXU matmul per sample, no transposes.
        logits = jnp.dot(w_m, x_m, preferred_element_type=jnp.float32)   # (K, S)

        # softmax over clusters (sublane axis).  Exact divide kept so the
        # 2e-5 check against the HIGHEST-precision reference holds.
        m = jnp.max(logits, axis=0, keepdims=True)
        e = jnp.exp(logits - m)
        a = e / jnp.sum(e, axis=0, keepdims=True)                 # (K, S)

        # a_sum via a free lane reduce (no ones-column matmul).
        a_sum = jnp.sum(a, axis=1, keepdims=True)                 # (K, 1)

        # vlad[k, c] = sum_s a[k, s] * x[c, s] - cent[k, c] * a_sum[k]
        dn = (((1,), (1,)), ((), ()))                             # contract S (trans_b)
        vlad = lax.dot_general(a.astype(mxu_dtype), x_m, dn,
                               preferred_element_type=jnp.float32)  # (K, C)
        vlad = vlad - cent * a_sum

        # intra-normalization (L2 over channels, per cluster)
        rsq = jnp.sum(vlad * vlad, axis=-1, keepdims=True)        # (K, 1)
        vlad = vlad * lax.rsqrt(jnp.maximum(rsq, EPS * EPS))

        # global L2 normalization over the flattened (K*C) descriptor
        gsq = jnp.sum(vlad * vlad, axis=(0, 1), keepdims=True)
        vlad = vlad * lax.rsqrt(jnp.maximum(gsq, EPS * EPS))

        out_ref[b] = vlad.astype(out_ref.dtype)
        return carry

    lax.fori_loop(0, batch_tile, body, 0, unroll=False)


def _pick_batch_tile(N, S, C, K, in_itemsize, out_itemsize, vmem_budget):
    """Largest batch tile whose pipelined working set fits the VMEM budget."""
    # Double-buffered DMA blocks scale with B; the per-sample f32 temps inside
    # the fori_loop do NOT (loop body bounds their live ranges).
    per_sample = 2 * C * S * in_itemsize + 2 * K * C * out_itemsize
    fixed = (4 * K * C * in_itemsize                 # w + centroids (double-buffered)
             + (2 * C * S + 4 * K * S + 3 * K * C) * 4)  # in-loop f32 temps + slack
    b = max(1, int((vmem_budget - fixed) // per_sample))
    b = min(b, 64)                                   # bound per-step latency
    b = min(b, max(1, -(-N // min(4, N))))           # >= min(4,N) grid steps (2 TCs on v7x)
    # Prefer a tile that divides N: no padded work, no lopsided TC load.
    best_div = max(d for d in range(1, b + 1) if N % d == 0)
    if 2 * best_div >= b:
        return int(best_div)
    return int(b)


def netvlad_forward(x_nchw, conv_weight, centroids, *, batch_tile=None,
                    mxu_dtype=jnp.float32):
    """x_nchw: (N, C, H, W); conv_weight: (K, C, 1, 1); centroids: (K, C).
    Returns (N, K*C) fully-normalized NetVLAD descriptors.
    Set mxu_dtype=jnp.bfloat16 on v5e to restore full MXU rate (re-check tolerance)."""
    N, C, H, W = x_nchw.shape
    K = centroids.shape[0]
    S = H * W
    in_itemsize = jnp.dtype(x_nchw.dtype).itemsize
    out_itemsize = in_itemsize

    # Generation-aware VMEM sizing (v5e/v6e: 128 MiB, v7x: 64 MiB per TC).
    try:
        vmem_cap = int(pltpu.get_tpu_info().vmem_capacity_bytes)
    except Exception:
        vmem_cap = 64 * 1024 * 1024                  # conservative fallback
    vmem_limit = min(int(vmem_cap * 0.7), 100 * 1024 * 1024)
    vmem_budget = max(4 * 1024 * 1024, vmem_limit - 8 * 1024 * 1024)

    B = (_pick_batch_tile(N, S, C, K, in_itemsize, out_itemsize, vmem_budget)
         if batch_tile is None else int(batch_tile))

    # Native layout: (N, C, S) is a pure reshape of NCHW (no HBM transpose).
    x_ncs = x_nchw.reshape(N, C, S)
    w_kc = conv_weight.reshape(K, C)

    n_pad = (-N) % B
    if n_pad:  # padded rows are fully clamped/normalized and then dropped
        x_ncs = jnp.pad(x_ncs, ((0, n_pad), (0, 0), (0, 0)))
    Np = N + n_pad

    kernel = functools.partial(_netvlad_kernel, batch_tile=B, mxu_dtype=mxu_dtype)

    out = pl.pallas_call(
        kernel,
        out_shape=jax.ShapeDtypeStruct((Np, K, C), x_nchw.dtype),
        grid_spec=pltpu.PrefetchScalarGridSpec(
            num_scalar_prefetch=0,
            grid=(Np // B,),
            in_specs=[
                pl.BlockSpec((B, C, S), lambda n: (n, 0, 0)),
                # w / centroids are tiny and constant across the grid.
                pl.BlockSpec((K, C), lambda n: (0, 0)),
                pl.BlockSpec((K, C), lambda n: (0, 0)),
            ],
            out_specs=pl.BlockSpec((B, K, C), lambda n: (n, 0, 0)),
        ),
        compiler_params=pltpu.CompilerParams(
            dimension_semantics=("parallel",),
            vmem_limit_bytes=vmem_limit,
        ),
    )(x_ncs, w_kc, centroids)

    if n_pad:
        out = out[:N]
    return out.reshape(N, K * C)


def netvlad_reference(x_nchw, conv_weight, centroids):
    """Pure-JAX reference mirroring the PyTorch forward."""
    N, C, H, W = x_nchw.shape
    K = centroids.shape[0]
    S = H * W
    hi = jax.lax.Precision.HIGHEST
    xn = x_nchw / jnp.maximum(
        jnp.linalg.norm(x_nchw, axis=1, keepdims=True), EPS)
    xf = xn.reshape(N, C, S)
    w = conv_weight.reshape(K, C)
    logits = jnp.einsum("kc,ncs->nks", w, xf, precision=hi)
    a = jax.nn.softmax(logits, axis=1)
    vlad = jnp.einsum("nks,ncs->nkc", a, xf, precision=hi) \
        - centroids[None] * jnp.sum(a, axis=2)[..., None]
    vlad = vlad / jnp.maximum(jnp.linalg.norm(vlad, axis=2, keepdims=True), EPS)
    vlad = vlad.reshape(N, -1)
    vlad = vlad / jnp.maximum(jnp.linalg.norm(vlad, axis=1, keepdims=True), EPS)
    return vlad


if __name__ == "__main__":
    # Small shapes consistent with the module: dim (channels) = 128,
    # num_clusters = 16, spatial 16x16, batch 4.
    N, C, H, W = 4, 128, 16, 16
    K = 16

    key = jax.random.PRNGKey(0)
    kx, kw, kc = jax.random.split(key, 3)

    x = jax.random.normal(kx, (N, C, H, W), dtype=jnp.float32)
    # nn.Conv2d default init ~ small uniform; deterministic here.
    conv_weight = (jax.random.uniform(kw, (K, C, 1, 1), dtype=jnp.float32) - 0.5) * 0.2
    # centroids = torch.rand(K, dim)  (uniform [0, 1))
    centroids = jax.random.uniform(kc, (K, C), dtype=jnp.float32)
    # NOTE: vladv2=False => no conv bias in forward (matches module defaults).

    out = jax.block_until_ready(netvlad_forward(x, conv_weight, centroids))
    ref = netvlad_reference(x, conv_weight, centroids)

    assert out.shape == (N, K * C)
    max_err = float(jnp.max(jnp.abs(out - ref)))
    assert jnp.allclose(out, ref, atol=2e-5, rtol=2e-5), max_err

    print("KERNEL_OK")
</pallas_src>

<mosaic_0001>
module attributes {stable_mosaic.version = 11 : i64} {
  func.func @_netvlad_kernel(%arg0: i32, %arg1: memref<1x128x256xf32, #tpu.memory_space<vmem>>, %arg2: memref<16x128xf32, #tpu.memory_space<vmem>>, %arg3: memref<16x128xf32, #tpu.memory_space<vmem>>, %arg4: memref<1x16x128xf32, #tpu.memory_space<vmem>>) attributes {dimension_semantics = [#tpu.dimension_semantics<parallel>], iteration_bounds = array<i64: 4>, scalar_prefetch = 0 : i64, scratch_operands = 0 : i64, tpu.core_type = #tpu.core_type<tc>, window_params = [{transform_indices = @transform_0, window_bounds = array<i64: 1, 128, 256>}, {pipeline_mode = #tpu.pipeline_mode<synchronous>, transform_indices = @transform_1, window_bounds = array<i64: 16, 128>}, {pipeline_mode = #tpu.pipeline_mode<synchronous>, transform_indices = @transform_2, window_bounds = array<i64: 16, 128>}, {transform_indices = @transform_3, window_bounds = array<i64: 1, 16, 128>}]} {
    %c0 = arith.constant 0 : index
    %c0_0 = arith.constant 0 : index
    %0 = vector.load %arg2[%c0, %c0_0] : memref<16x128xf32, #tpu.memory_space<vmem>>, vector<16x128xf32>
    %c0_1 = arith.constant 0 : index
    %c0_2 = arith.constant 0 : index
    %1 = vector.load %arg3[%c0_1, %c0_2] : memref<16x128xf32, #tpu.memory_space<vmem>>, vector<16x128xf32>
    %c0_i32 = arith.constant 0 : i32
    %2 = arith.index_cast %c0_i32 : i32 to index
    %c0_3 = arith.constant 0 : index
    %c0_4 = arith.constant 0 : index
    %3 = vector.load %arg1[%2, %c0_3, %c0_4] : memref<1x128x256xf32, #tpu.memory_space<vmem>>, vector<1x128x256xf32>
    %4 = vector.shape_cast %3 : vector<1x128x256xf32> to vector<128x256xf32>
    %5 = arith.mulf %4, %4 : vector<128x256xf32>
    %cst = arith.constant dense<0.000000e+00> : vector<256xf32>
    %6 = vector.multi_reduction <add>, %5, %cst [0] : vector<128x256xf32> to vector<256xf32>
    %7 = vector.shape_cast %6 : vector<256xf32> to vector<1x256xf32>
    %cst_5 = arith.constant 1.000000e-24 : f32
    %8 = vector.broadcast %cst_5 : f32 to vector<1x256xf32>
    %9 = arith.maximumf %7, %8 : vector<1x256xf32>
    %10 = math.rsqrt %9 : vector<1x256xf32>
    %11 = vector.broadcast %10 : vector<1x256xf32> to vector<128x256xf32>
    %12 = arith.mulf %4, %11 : vector<128x256xf32>
    %cst_6 = arith.constant dense<0.000000e+00> : vector<16x256xf32>
    %13 = tpu.matmul %0, %12, %cst_6 {dimension_numbers = #tpu.dot_dimension_numbers<[1], [0], [0], [1], [0, 0, 1, 1], [], []>} : vector<16x128xf32>, vector<128x256xf32>, vector<16x256xf32> -> vector<16x256xf32>
    %cst_7 = arith.constant dense<0xFF800000> : vector<256xf32>
    %14 = vector.multi_reduction <maximumf>, %13, %cst_7 [0] : vector<16x256xf32> to vector<256xf32>
    %15 = vector.shape_cast %14 : vector<256xf32> to vector<1x256xf32>
    %16 = vector.broadcast %15 : vector<1x256xf32> to vector<16x256xf32>
    %17 = arith.subf %13, %16 : vector<16x256xf32>
    %18 = math.exp %17 : vector<16x256xf32>
    %cst_8 = arith.constant dense<0.000000e+00> : vector<256xf32>
    %19 = vector.multi_reduction <add>, %18, %cst_8 [0] : vector<16x256xf32> to vector<256xf32>
    %20 = vector.shape_cast %19 : vector<256xf32> to vector<1x256xf32>
    %21 = vector.broadcast %20 : vector<1x256xf32> to vector<16x256xf32>
    %22 = arith.divf %18, %21 : vector<16x256xf32>
    %cst_9 = arith.constant dense<0.000000e+00> : vector<16xf32>
    %23 = vector.multi_reduction <add>, %22, %cst_9 [1] : vector<16x256xf32> to vector<16xf32>
    %24 = vector.shape_cast %23 : vector<16xf32> to vector<16x1xf32>
    %cst_10 = arith.constant dense<0.000000e+00> : vector<16x128xf32>
    %25 = tpu.matmul %22, %12, %cst_10 {dimension_numbers = #tpu.dot_dimension_numbers<[1], [1], [0], [0], [0, 0, 1, 0], [], []>} : vector<16x256xf32>, vector<128x256xf32>, vector<16x128xf32> -> vector<16x128xf32>
    %26 = vector.broadcast %24 : vector<16x1xf32> to vector<16x128xf32>
    %27 = arith.mulf %1, %26 : vector<16x128xf32>
    %28 = arith.subf %25, %27 : vector<16x128xf32>
    %29 = arith.mulf %28, %28 : vector<16x128xf32>
    %cst_11 = arith.constant dense<0.000000e+00> : vector<16xf32>
    %30 = vector.multi_reduction <add>, %29, %cst_11 [1] : vector<16x128xf32> to vector<16xf32>
    %31 = vector.shape_cast %30 : vector<16xf32> to vector<16x1xf32>
    %cst_12 = arith.constant 1.000000e-24 : f32
    %32 = vector.broadcast %cst_12 : f32 to vector<16x1xf32>
    %33 = arith.maximumf %31, %32 : vector<16x1xf32>
    %34 = math.rsqrt %33 : vector<16x1xf32>
    %35 = vector.broadcast %34 : vector<16x1xf32> to vector<16x128xf32>
    %36 = arith.mulf %28, %35 : vector<16x128xf32>
    %37 = arith.mulf %36, %36 : vector<16x128xf32>
    %38 = vector.shape_cast %37 : vector<16x128xf32> to vector<1x16x128xf32>
    %cst_13 = arith.constant dense<0.000000e+00> : vector<1xf32>
    %39 = vector.multi_reduction <add>, %38, %cst_13 [1, 2] : vector<1x16x128xf32> to vector<1xf32>
    %40 = vector.shape_cast %39 : vector<1xf32> to vector<1x1x1xf32>
    %41 = vector.extract %40[0, 0, 0] : f32 from vector<1x1x1xf32>
    %42 = vector.broadcast %41 : f32 to vector<1x1xf32>
    %cst_14 = arith.constant 1.000000e-24 : f32
    %43 = vector.broadcast %cst_14 : f32 to vector<1x1xf32>
    %44 = arith.maximumf %42, %43 : vector<1x1xf32>
    %45 = math.rsqrt %44 : vector<1x1xf32>
    %46 = vector.broadcast %45 : vector<1x1xf32> to vector<16x128xf32>
    %47 = arith.mulf %36, %46 : vector<16x128xf32>
    %48 = arith.index_cast %c0_i32 : i32 to index
    %c0_15 = arith.constant 0 : index
    %c0_16 = arith.constant 0 : index
    %49 = vector.load %arg4[%48, %c0_15, %c0_16] : memref<1x16x128xf32, #tpu.memory_space<vmem>>, vector<1x16x128xf32>
    %50 = vector.shape_cast %49 : vector<1x16x128xf32> to vector<16x128xf32>
    %51 = vector.shape_cast %47 : vector<16x128xf32> to vector<1x16x128xf32>
    tpu.vector_store %arg4[%48, %c0_15, %c0_16], %51 {strides = array<i32>} : memref<1x16x128xf32, #tpu.memory_space<vmem>>, vector<1x16x128xf32>,
    %c1_i32 = arith.constant 1 : i32
    return
  }
  func.func @transform_0(%arg0: i32) -> (i32, i32, i32) {
    %c0_i32 = arith.constant 0 : i32
    %c0_i32_0 = arith.constant 0 : i32
    %c0_i32_1 = arith.constant 0 : i32
    return %arg0, %c0_i32, %c0_i32_0 : i32, i32, i32
  }
  func.func @transform_1(%arg0: i32) -> (i32, i32) {
    %c0_i32 = arith.constant 0 : i32
    %c0_i32_0 = arith.constant 0 : i32
    %c0_i32_1 = arith.constant 0 : i32
    return %c0_i32, %c0_i32_0 : i32, i32
  }
  func.func @transform_2(%arg0: i32) -> (i32, i32) {
    %c0_i32 = arith.constant 0 : i32
    %c0_i32_0 = arith.constant 0 : i32
    %c0_i32_1 = arith.constant 0 : i32
    return %c0_i32, %c0_i32_0 : i32, i32
  }
  func.func @transform_3(%arg0: i32) -> (i32, i32, i32) {
    %c0_i32 = arith.constant 0 : i32
    %c0_i32_0 = arith.constant 0 : i32
    %c0_i32_1 = arith.constant 0 : i32
    return %arg0, %c0_i32, %c0_i32_0 : i32, i32, i32
  }
}

</mosaic_0001>

<bundles_post_ra>
// kernel: tpu_custom_call.1
= control target key start
LH: loop header
LB: loop body
LE: loop exit
PB: predicated region body
PF: predicated region fallthrough
CT: control target
= control target key end

     0   :  { %8 = vsyncpa [#allocation3], 0  ;;  %s1392_s0 = inlined_call_operand.hbm [shape: f32[4,128,256], index: 0, kind: input, shape index: {}]   ;;  %s1393_s1 = inlined_call_operand.hbm [shape: f32[16,128], index: 1, kind: input, shape index: {}]   ;;  %s1394_s2 = inlined_call_operand.hbm [shape: f32[16,128], index: 2, kind: input, shape index: {}]   ;;  %s1395_s3 = inlined_call_operand.hbm [shape: f32[4,16,128], index: 3, kind: output, shape index: {}]  }
   0x1   :  { %10 = vsyncpa [#allocation3 + $0x1], 0 }
   0x2   :  { %11 = vsyncpa [#allocation6], 0 }
   0x3   :  { %12 = vsyncpa [#allocation4], 0 }
   0x4   :  { %14 = vsyncpa [#allocation4 + $0x1], 0  ;;  %s1008_s12 = smov 0   ;;  %s1010_s13 = smov 0  }
   0x5   :  { %s1012_s14 = smov 0   ;;  %s1014_s15 = smov 0  }
   0x6 LB: > { %s1029_s16 = sadd.s32 4294967295, %s975_s15   ;;  %s709_s17 = sadd.s32 4294967294, %s975_s15   ;;  %s975_s15 = sphi %s1014_s15, %s1416_s15   ;;  %s971_s14 = sphi %s1012_s14, %s1415_s14   ;;  %s967_s13 = sphi %s1010_s13, %s1414_s13   ;;  %s963_s12 = sphi %s1008_s12, %s1413_s12  }
   0x7   : > { %p40_p0 = scmp.ne.s32.totalorder %s967_s13, %s963_s12  ;;  %p1396_p1 = scmp.eq.s32.totalorder %s1029_s16, 0 }
   0x8   : > { %p112_p3 = scmp.eq.s32.totalorder %s709_s17, 3  ;;  %p710_p5 = scmp.ge.s32.totalorder %s975_s15, 1 }
   0x9   : > { %p1038_p4 = por %p1396_p1, %p40_p0  ;;  %p119_p7 = scmp.lt.s32.totalorder %s975_s15, 5 }
   0xa   : > { %p1043_p6 = por %p112_p3, %p40_p0  ;;  %s977_s21 = smov [#allocation5]  }
   0xb   : > { %s1400_s18 = scalar_select %p1038_p4, 1, 0 }
   0xc   : > { %s1401_s19 = scalar_select %p1043_p6, 1, 0 }
   0xd   : > { %p1048_p8 = pnand %p710_p5, %p119_p7  ;;  %s131_s22 = sshll.u32 %s977_s21, 4  ;;  %s132_s22 = int_to_ptr.vmem [resolvable:$true] %s131_s22 }
   0xe   : > { %s978_s24 = smov [#allocation7]   ;;  %s838_s26 = scalar_lea.vmem %s132_s22, 256 }
   0xf   : > { %s1402_s20 = scalar_select %p1048_p8, 1, 0 }
  0x10   : > { %p743_p9 = pneg %p1048_p8  ;;  %s144_s25 = sshll.u32 %s978_s24, 4  ;;  %s145_s25 = int_to_ptr.vmem [resolvable:$true] %s144_s25 }
  0x11   : > { %p839_p12 = scmp.ne.s32.totalorder %s132_s22, %s838_s26  ;;  %p846_p3 = scmp.lt.s32.totalorder %s132_s22, %s132_s22 }
  0x12   : > { %p1056_p10 = pnand %p743_p9, %p1396_p1  ;;  %p847_p5 = scmp.lt.s32.totalorder %s838_s26, %s838_s26 }
  0x14   : > { %p829_p11 = pneg %p1056_p10  ;;  %p848_p7 = por %p847_p5, %p846_p3 }
  0x16   : > { %p841_p13 = pnand %p839_p12, %p829_p11 }
  0x18   : > { %p842_p0 = pneg %p841_p13 }
  0x1a   : > { %p849_p9 = pnand %p848_p7, %p842_p0 }
  0x1c   : > { %852 = shalt.err (!%p849_p9)
}
  0x1d   : > { %s979_s27 = smov 128   ;;  %s980_s28 = smov 8  }
  0x1e   : > { %746 = dma.hbm_to_vmem [thread:$0]  (!%p1056_p10), %s1393_s1, 256, %s132_s22, [#allocation6], %s979_s27, %s979_s27, %s980_s28  }
  0x1f   : > { %s864_s4 = scalar_lea.vmem %s145_s25, 256  ;;  %p872_p2 = scmp.lt.s32.totalorder %s145_s25, %s145_s25 }
  0x20   : > { %p865_p1 = scmp.ne.s32.totalorder %s145_s25, %s864_s4  ;;  %p873_p6 = scmp.lt.s32.totalorder %s864_s4, %s864_s4 }
  0x22   : > { %p867_p12 = pnand %p865_p1, %p829_p11  ;;  %p874_p3 = por %p873_p6, %p872_p2 }
  0x24   : > { %p868_p13 = pneg %p867_p12 }
  0x26   : > { %p875_p0 = pnand %p874_p3, %p868_p13 }
  0x28   : > { %878 = shalt.err (!%p875_p0)
}
  0x29   : > { %749 = dma.hbm_to_vmem [thread:$0]  (!%p1056_p10), %s1394_s2, 256, %s145_s25, [#allocation6], %s979_s27, %s979_s27, %s980_s28  }
  0x2a   : > { %s1079_s7 = sadd.s32 1, %s975_s15   ;;  %s27_s8 = sadd.s32 1, %s971_s14 }
  0x2b   : > { %s24_s9 = ssub.s32 %s975_s15, %s1079_s7  ;;  %p34_p1 = scmp.ne.s32.totalorder %s971_s14, %s967_s13 }
  0x2c   : > { %p25_p2 = scmp.eq.s32.totalorder %s24_s9, 0  ;;  %p35_p6 = scmp.eq.s32.totalorder %s975_s15, 0 }
  0x2d   : > { %p1404_p11 = scmp.eq.s32.totalorder %s1029_s16, 3  ;;  %p760_p7 = scmp.lt.s32.totalorder %s975_s15, 4 }
  0x2e   : > { %s1095_s11 = scalar_select %p25_p2, %s971_s14, %s27_s8  }
  0x2f   : > { %p1089_p5 = por %p1404_p11, %p34_p1  ;;  %p36_p9 = por %p35_p6, %p34_p1 }
  0x30   : > { %s158_s17 = sand.u32 1, %s971_s14   ;;  %s727_s22 = sshll.u32 %s975_s15, 12 }
  0x31   : > { %s1405_s10 = scalar_select %p1089_p5, 1, 0 }
  0x32   : > { %s714_s21 = sshll.u32 %s158_s17, 8  ;;  %s1102_s25 = scalar_lea.hbm %s1392_s0, %s727_s22 }
  0x33   : > { %s162_s26 = scalar_lea.vmem [#allocation2], %s714_s21  ;;  %p1106_p10 = pnand %p760_p7, %p36_p9 }
  0x34   : > { %s169_s27 = sshll.u32 %s162_s26, 4  ;;  %s1110_s29 = scalar_lea.sflag [#allocation3], %s158_s17  ;;  %s1104_s27 = int_to_ptr.vmem [resolvable:$true] %s169_s27 }
  0x35   : > { %s879_s30 = scalar_lea.hbm %s1102_s25, 4096  ;;  %p881_p13 = pneg %p1106_p10 }
  0x36   : > { %p880_p12 = scmp.ne.s32.totalorder %s1102_s25, %s879_s30  ;;  %s884_s6 = scalar_lea.hbm %s1392_s0, 16384 }
  0x37   : > { %p885_p1 = scmp.lt.s32.totalorder %s1102_s25, %s1392_s0  ;;  %p886_p2 = scmp.lt.s32.totalorder %s884_s6, %s879_s30 }
  0x38   : > { %p882_p3 = pnand %p881_p13, %p880_p12 }
  0x39   : > { %p887_p6 = por %p886_p2, %p885_p1 }
  0x3a   : > { %p883_p0 = pneg %p882_p3 }
  0x3c   : > { %p888_p11 = pnand %p887_p6, %p883_p0 }
  0x3e   : > { %891 = shalt.err (!%p888_p11)
}
  0x3f   : > { %s892_s17 = scalar_lea.vmem %s1104_s27, 4096  ;;  %s981_s21 = smov [#allocation2]  }
  0x40   : > { %p893_p7 = scmp.ne.s32.totalorder %s1104_s27, %s892_s17  ;;  %s897_s22 = sshll.u32 %s981_s21, 4  ;;  %s898_s22 = int_to_ptr.vmem [resolvable:$false] %s897_s22 }
  0x41   : > { %s899_s23 = scalar_lea.vmem %s898_s22, 8192  ;;  %p900_p3 = scmp.lt.s32.totalorder %s1104_s27, %s898_s22 }
  0x42   : > { %p895_p9 = pnand %p893_p7, %p881_p13  ;;  %p901_p5 = scmp.lt.s32.totalorder %s899_s23, %s892_s17 }
  0x44   : > { %p896_p12 = pneg %p895_p9  ;;  %p902_p4 = por %p901_p5, %p900_p3 }
  0x46   : > { %p903_p8 = pnand %p902_p4, %p896_p12 }
  0x48   : > { %906 = shalt.err (!%p903_p8)
}
  0x49   : > { %s982_s24 = smov 256   ;;  %s983_s26 = smov 16  }
  0x4a   : > { %753 = dma.hbm_to_vmem [thread:$0]  (!%p1106_p10), %s1102_s25, 4096, %s1104_s27, %s1110_s29, %s982_s24, %s982_s24, %s983_s26  }
  0x4b   : > { %p1407_p13 = scmp.ne.s32.totalorder %s1402_s20, 0 }
  0x4c   : > { %s1134_s30 = sand.u32 (!%p1407_p13), 1, %s967_s13   ;;  %p1408_p4 = scmp.ne.s32.totalorder (!%p1407_p13), %s1400_s18, 0 }
  0x4d   : > { %181 = sbr.rel (%p1407_p13) target bundleno = 1039 (0x40f), region = 32  ;;  %s718_s4 = sshll.u32 (!%p1407_p13), %s1134_s30, 8 }
  0x4e   : > { %s184_s5 = scalar_lea.sflag (!%p1407_p13), [#allocation3], %s1134_s30  ;;  %s1138_s6 = scalar_lea.vmem (!%p1407_p13), [#allocation2], %s718_s4 }
  0x52   : > { %950 = dma.done.wait (%p1408_p4), %s184_s5, 4096  }
  0x53   : > { %952 = vsyncadd (%p1408_p4), %s184_s5, 4294963200  ;;  %p1409_p8 = scmp.eq.s32.totalorder %s1029_s16, 0 }
  0x55   : > { %954 = dma.done.wait (%p1409_p8), [#allocation6], 512   ;;  %p1410_p5 = pmov %p1409_p8 }
  0x56   : > { %v984_v0 = vmov 0.0   ;;  %v1150_v1 = vld [vmem:[%s1138_s6 + $0x8] sm:$0xff]  ;;  %v1153_v2 = vld [vmem:[%s1138_s6 + $0x18] sm:$0xff]  ;;  %v1178_v14 = vld [vmem:[%s1138_s6] sm:$0xff]  ;;  %s721_s20 = sshll.u32 %s1134_s30, 4  ;;  %s728_s25 = sshll.u32 %s1029_s16, 8 }
  0x57   : > { %956 = vsyncadd (%p1410_p5), [#allocation6], 4294966784  ;;  %428 = vmatprep.mubr.f32.mxu0 %v984_v0  ;;  %v1156_v3 = vld [vmem:[%s1138_s6 + $0x28] sm:$0xff]  ;;  %v1159_v4 = vld [vmem:[%s1138_s6 + $0x38] sm:$0xff]  ;;  %v255_v5 = vmul.f32 %v1150_v1, %v1150_v1  ;;  %v257_v6 = vmul.f32 %v1153_v2, %v1153_v2  ;;  %v254_v19 = vmul.f32 %v1178_v14, %v1178_v14  ;;  %s217_s27 = scalar_lea.vmem [#allocation8], %s721_s20  ;;  %s1348_s9 = scalar_lea.hbm %s1395_s3, %s728_s25 }
  0x58   : > { %v259_v7 = vmul.f32 %v1156_v3, %v1156_v3  ;;  %v1168_v8 = vld [vmem:[%s1138_s6 + $0x48] sm:$0xff]  ;;  %v261_v9 = vmul.f32 %v1159_v4, %v1159_v4  ;;  %v1173_v11 = vld [vmem:[%s1138_s6 + $0x58] sm:$0xff]  ;;  %v1181_v15 = vld [vmem:[%s1138_s6 + $0x10] sm:$0xff]  ;;  %s617_s28 = sshll.u32 %s217_s27, 4  ;;  %s604_s17 = scalar_lea.sflag [#allocation4], %s1134_s30  ;;  %s1350_s28 = int_to_ptr.vmem [resolvable:$true] %s617_s28 }
  0x59   : > { %v307_v10 = vadd.f32 %v257_v6, %v255_v5  ;;  %v263_v12 = vmul.f32 %v1168_v8, %v1168_v8  ;;  %v1184_v16 = vld [vmem:[%s1138_s6 + $0x68] sm:$0xff]  ;;  %v1187_v17 = vld [vmem:[%s1138_s6 + $0x20] sm:$0xff]  ;;  %v1190_v18 = vld [vmem:[%s1138_s6 + $0x30] sm:$0xff]  ;;  %v256_v20 = vmul.f32 %v1181_v15, %v1181_v15  ;;  %v265_v21 = vmul.f32 %v1173_v11, %v1173_v11  ;;  %s907_s21 = scalar_lea.vmem %s1350_s28, 256  ;;  %p1411_p0 = scmp.ne.s32.totalorder %s1405_s10, 0 }
  0x5a   : > { %v1199_v23 = vld [vmem:[%s1138_s6 + $0x40] sm:$0xff]  ;;  %v258_v24 = vmul.f32 %v1187_v17, %v1187_v17  ;;  %v1204_v25 = vld [vmem:[%s1138_s6 + $0x78] sm:$0xff]  ;;  %v260_v26 = vmul.f32 %v1190_v18, %v1190_v18  ;;  %v267_v28 = vmul.f32 %v1184_v16, %v1184_v16  ;;  %v1211_v30 = vld [vmem:[%s1138_s6 + $0x50] sm:$0xff]  ;;  %p908_p10 = scmp.ne.s32.totalorder %s1350_s28, %s907_s21  ;;  %s985_s16 = smov [#allocation8]  }
  0x5b   : > { %v308_v13 = vadd.f32 %v307_v10, %v259_v7  ;;  %v286_v27 = vadd.f32 %v256_v20, %v254_v19  ;;  %v1214_v31 = vld [vmem:[%s1138_s6 + $0x88] sm:$0xff]  ;;  %v262_v32 = vmul.f32 %v1199_v23, %v1199_v23  ;;  %v269_v34 = vmul.f32 %v1204_v25, %v1204_v25  ;;  %v1221_v36 = vld [vmem:[%s1138_s6 + $0x60] sm:$0xff]  ;;  %v1224_v37 = vld [vmem:[%s1138_s6 + $0x98] sm:$0xff]  ;;  %s911_s22 = sshll.u32 %s985_s16, 4  ;;  %s912_s22 = int_to_ptr.vmem [resolvable:$false] %s911_s22 }
  0x5c   : > { %v264_v38 = vmul.f32 %v1211_v30, %v1211_v30  ;;  %v271_v40 = vmul.f32 %v1214_v31, %v1214_v31  ;;  %v1231_v42 = vld [vmem:[%s1138_s6 + $0x70] sm:$0xff]  ;;  %v1234_v43 = vld [vmem:[%s1138_s6 + $0xa8] sm:$0xff]  ;;  %v266_v44 = vmul.f32 %v1221_v36, %v1221_v36  ;;  %v273_v46 = vmul.f32 %v1224_v37, %v1224_v37  ;;  %v1241_v48 = vld [vmem:[%s1138_s6 + $0x80] sm:$0xff]  ;;  %p909_p1 = pnand %p908_p10, %p1411_p0  ;;  %s913_s23 = scalar_lea.vmem %s912_s22, 512 }
  0x5d   : > { %v309_v22 = vadd.f32 %v308_v13, %v261_v9  ;;  %v287_v33 = vadd.f32 %v286_v27, %v258_v24  ;;  %v1244_v49 = vld [vmem:[%s1138_s6 + $0xb8] sm:$0xff]  ;;  %v268_v50 = vmul.f32 %v1231_v42, %v1231_v42  ;;  %v275_v52 = vmul.f32 %v1234_v43, %v1234_v43  ;;  %v1251_v54 = vld [vmem:[%s1138_s6 + $0x90] sm:$0xff]  ;;  %v1254_v55 = vld [vmem:[%s1138_s6 + $0xc8] sm:$0xff]  ;;  %p914_p6 = scmp.lt.s32.totalorder %s1350_s28, %s912_s22  ;;  %p915_p11 = scmp.lt.s32.totalorder %s913_s23, %s907_s21 }
  0x5e   : > { %v270_v56 = vmul.f32 %v1241_v48, %v1241_v48  ;;  %v277_v58 = vmul.f32 %v1244_v49, %v1244_v49  ;;  %v1261_v60 = vld [vmem:[%s1138_s6 + $0xa0] sm:$0xff]  ;;  %v249_v61 = vld [vmem:[%s1138_s6 + $0xd8] sm:$0xff]  ;;  %v272_v62 = vmul.f32 %v1251_v54, %v1251_v54  ;;  %v279_v5 = vmul.f32 %v1254_v55, %v1254_v55  ;;  %v1269_v7 = vld [vmem:[%s1138_s6 + $0xb0] sm:$0xff]  ;;  %p910_p2 = pneg %p909_p1 }
  0x5f   : > { %v310_v29 = vadd.f32 %v309_v22, %v263_v12  ;;  %v288_v39 = vadd.f32 %v287_v33, %v260_v26  ;;  %v251_v9 = vld [vmem:[%s1138_s6 + $0xe8] sm:$0xff]  ;;  %v274_v10 = vmul.f32 %v1261_v60, %v1261_v60  ;;  %v281_v13 = vmul.f32 %v249_v61, %v249_v61  ;;  %v246_v20 = vld [vmem:[%s1138_s6 + $0xc0] sm:$0xff]  ;;  %p916_p7 = por %p915_p11, %p914_p6 }
  0x60   : > { %v276_v22 = vmul.f32 %v1269_v7, %v1269_v7  ;;  %v283_v26 = vmul.f32 %v251_v9, %v251_v9 }
  0x61   : > { %v311_v35 = vadd.f32 %v310_v29, %v265_v21  ;;  %v289_v45 = vadd.f32 %v288_v39, %v262_v32  ;;  %v253_v21 = vld [vmem:[%s1138_s6 + $0xf8] sm:$0xff]  ;;  %v278_v29 = vmul.f32 %v246_v20, %v246_v20  ;;  %p917_p9 = pnand %p916_p7, %p910_p2 }
  0x62   : > { %v285_v33 = vmul.f32 %v253_v21, %v253_v21 }
  0x63   : > { %v312_v41 = vadd.f32 %v311_v35, %v267_v28  ;;  %v290_v51 = vadd.f32 %v289_v45, %v264_v38  ;;  %v248_v28 = vld [vmem:[%s1138_s6 + $0xd0] sm:$0xff]  ;;  %v250_v35 = vld [vmem:[%s1138_s6 + $0xe0] sm:$0xff] }
  0x64   : > { %v280_v38 = vmul.f32 %v248_v28, %v248_v28 }
  0x65   : > { %v313_v47 = vadd.f32 %v312_v41, %v269_v34  ;;  %v291_v57 = vadd.f32 %v290_v51, %v266_v44  ;;  %v252_v41 = vld [vmem:[%s1138_s6 + $0xf0] sm:$0xff]  ;;  %v282_v44 = vmul.f32 %v250_v35, %v250_v35 }
  0x67   : > { %v314_v53 = vadd.f32 %v313_v47, %v271_v40  ;;  %v292_v63 = vadd.f32 %v291_v57, %v268_v50  ;;  %v284_v47 = vmul.f32 %v252_v41, %v252_v41 }
  0x69   : > { %v315_v59 = vadd.f32 %v314_v53, %v273_v46  ;;  %v293_v12 = vadd.f32 %v292_v63, %v270_v56 }
  0x6b   : > { %v316_v6 = vadd.f32 %v315_v59, %v275_v52  ;;  %v294_v24 = vadd.f32 %v293_v12, %v272_v62 }
  0x6d   : > { %v317_v19 = vadd.f32 %v316_v6, %v277_v58  ;;  %v295_v32 = vadd.f32 %v294_v24, %v274_v10 }
  0x6f   : > { %v318_v27 = vadd.f32 %v317_v19, %v279_v5  ;;  %v296_v39 = vadd.f32 %v295_v32, %v276_v22 }
  0x71   : > { %v319_v34 = vadd.f32 %v318_v27, %v281_v13  ;;  %v297_v45 = vadd.f32 %v296_v39, %v278_v29 }
  0x73   : > { %v320_v40 = vadd.f32 %v319_v34, %v283_v26  ;;  %v298_v50 = vadd.f32 %v297_v45, %v280_v38 }
  0x75   : > { %v321_v46 = vadd.f32 %v320_v40, %v285_v33  ;;  %v299_v52 = vadd.f32 %v298_v50, %v282_v44 }
  0x77   : > { %v322_v51 = vrot.slane %v321_v46, 4  ;;  %v300_v56 = vadd.f32 %v299_v52, %v284_v47 }
  0x79   : > { %v323_v53 = vadd.f32 %v322_v51, %v321_v46  ;;  %v301_v58 = vrot.slane %v300_v56, 4 }
  0x7b   : > { %v324_v57 = vrot.slane %v323_v53, 2  ;;  %v302_v62 = vadd.f32 %v301_v58, %v300_v56 }
  0x7d   : > { %v325_v59 = vadd.f32 %v324_v57, %v323_v53  ;;  %v303_v5 = vrot.slane %v302_v62, 2 }
  0x7f   : > { %v326_v63 = vrot.slane %v325_v59, 1  ;;  %v304_v10 = vadd.f32 %v303_v5, %v302_v62 }
  0x81   : > { %v327_v6 = vadd.f32 %v326_v63, %v325_v59  ;;  %v305_v13 = vrot.slane %v304_v10, 1 }
  0x83   : > { %v329_v12 = vmax.f32 %v327_v6, 1e-24  ;;  %v306_v19 = vadd.f32 %v305_v13, %v304_v10 }
  0x85   : > { %805 = vrsqrt.f32 %v329_v12  ;;  %v328_v22 = vmax.f32 %v306_v19, 1e-24 }
  0x87   : > { %807 = vrsqrt.f32 %v328_v22 }
  0x92   : > { %v1281_v24 = vpop.eup %805 }
  0x93   : > { %v363_v26 = vmul.f32 %v1281_v24, %v253_v21  ;;  %v361_v29 = vmul.f32 %v1281_v24, %v251_v9  ;;  %v359_v34 = vmul.f32 %v1281_v24, %v249_v61  ;;  %v357_v39 = vmul.f32 %v1281_v24, %v1254_v55 }
  0x94   : > { %v1284_v27 = vpop.eup %807  ;;  %v355_v9 = vmul.f32 %v1281_v24, %v1244_v49 }
  0x95   : > { %364 = vmatprep.subr.mxu0 %v363_v26  ;;  %493 = vmatprep.subr.mxu1 %v363_v26  ;;  %v362_v32 = vmul.f32 %v1284_v27, %v252_v41  ;;  %v360_v33 = vmul.f32 %v1284_v27, %v250_v35  ;;  %v358_v38 = vmul.f32 %v1284_v27, %v248_v28 }
  0x96   : > { %v356_v21 = vmul.f32 %v1284_v27, %v246_v20  ;;  %v354_v61 = vmul.f32 %v1284_v27, %v1269_v7  ;;  %v353_v28 = vmul.f32 %v1281_v24, %v1234_v43  ;;  %v352_v55 = vmul.f32 %v1284_v27, %v1261_v60 }
  0x97   : > { %365 = vmatpush1.msra.mxu0 %v362_v32  ;;  %494 = vmatpush1.xpose.msra.mxu1 %v362_v32  ;;  %v351_v20 = vmul.f32 %v1281_v24, %v1224_v37  ;;  %v350_v49 = vmul.f32 %v1284_v27, %v1251_v54  ;;  %v349_v7 = vmul.f32 %v1281_v24, %v1214_v31 }
  0x98   : > { %366 = vmatprep.subr.mxu0 %v361_v29  ;;  %495 = vmatprep.subr.mxu1 %v361_v29  ;;  %v348_v43 = vmul.f32 %v1284_v27, %v1241_v48  ;;  %v347_v60 = vmul.f32 %v1281_v24, %v1204_v25  ;;  %v346_v37 = vmul.f32 %v1284_v27, %v1231_v42 }
  0x99   : > { %367 = vmatpush1.msra.mxu0 %v360_v33  ;;  %v345_v54 = vmul.f32 %v1281_v24, %v1184_v16  ;;  %v344_v31 = vmul.f32 %v1284_v27, %v1221_v36  ;;  %v343_v48 = vmul.f32 %v1281_v24, %v1173_v11  ;;  %v342_v25 = vmul.f32 %v1284_v27, %v1211_v30 }
  0x9a   : > { %368 = vmatprep.subr.mxu0 %v359_v34  ;;  %v341_v42 = vmul.f32 %v1281_v24, %v1168_v8  ;;  %v340_v16 = vmul.f32 %v1284_v27, %v1199_v23  ;;  %v339_v36 = vmul.f32 %v1281_v24, %v1159_v4  ;;  %v338_v11 = vmul.f32 %v1284_v27, %v1190_v18 }
  0x9b   : > { %369 = vmatpush1.msra.mxu0 %v358_v38  ;;  %496 = vmatpush1.xpose.msra.mxu1 %v360_v33  ;;  %v337_v30 = vmul.f32 %v1281_v24, %v1156_v3  ;;  %v336_v8 = vmul.f32 %v1284_v27, %v1187_v17  ;;  %v335_v23 = vmul.f32 %v1281_v24, %v1153_v2  ;;  %v218_v17 = vld [vmem:[#allocation5] sm:$0xff]  ;;  %v219_v2 = vld [vmem:[#allocation5 + $0x8] sm:$0xff] }
  0x9c   : > { %370 = vmatprep.subr.mxu0 %v357_v39  ;;  %497 = vmatprep.subr.mxu1 %v359_v34  ;;  %v334_v4 = vmul.f32 %v1284_v27, %v1181_v15  ;;  %v333_v18 = vmul.f32 %v1281_v24, %v1150_v1  ;;  %v332_v3 = vmul.f32 %v1284_v27, %v1178_v14 }
  0x9d   : > { %371 = vmatpush1.msra.mxu0 %v356_v21 }
  0x9e   : > { %372 = vmatprep.subr.mxu0 %v355_v9 }
  0x9f   : > { %373 = vmatpush1.msra.mxu0 %v354_v61  ;;  %498 = vmatpush1.xpose.msra.mxu1 %v358_v38 }
  0xa0   : > { %374 = vmatprep.subr.mxu0 %v353_v28  ;;  %499 = vmatprep.subr.mxu1 %v357_v39 }
  0xa1   : > { %375 = vmatpush1.msra.mxu0 %v352_v55 }
  0xa2   : > { %376 = vmatprep.subr.mxu0 %v351_v20 }
  0xa3   : > { %377 = vmatpush1.msra.mxu0 %v350_v49  ;;  %500 = vmatpush1.xpose.msra.mxu1 %v356_v21 }
  0xa4   : > { %378 = vmatprep.subr.mxu0 %v349_v7  ;;  %501 = vmatprep.subr.mxu1 %v355_v9 }
  0xa5   : > { %379 = vmatpush1.msra.mxu0 %v348_v43 }
  0xa6   : > { %380 = vmatprep.subr.mxu0 %v347_v60 }
  0xa7   : > { %381 = vmatpush1.msra.mxu0 %v346_v37  ;;  %502 = vmatpush1.xpose.msra.mxu1 %v354_v61 }
  0xa8   : > { %382 = vmatprep.subr.mxu0 %v345_v54  ;;  %503 = vmatprep.subr.mxu1 %v353_v28 }
  0xa9   : > { %383 = vmatpush1.msra.mxu0 %v344_v31 }
  0xaa   : > { %384 = vmatprep.subr.mxu0 %v343_v48 }
  0xab   : > { %385 = vmatpush1.msra.mxu0 %v342_v25  ;;  %504 = vmatpush1.xpose.msra.mxu1 %v352_v55 }
  0xac   : > { %386 = vmatprep.subr.mxu0 %v341_v42  ;;  %505 = vmatprep.subr.mxu1 %v351_v20 }
  0xad   : > { %387 = vmatpush1.msra.mxu0 %v340_v16 }
  0xae   : > { %388 = vmatprep.subr.mxu0 %v339_v36 }
  0xaf   : > { %389 = vmatpush1.msra.mxu0 %v338_v11  ;;  %506 = vmatpush1.xpose.msra.mxu1 %v350_v49 }
  0xb0   : > { %390 = vmatprep.subr.mxu0 %v337_v30  ;;  %507 = vmatprep.subr.mxu1 %v349_v7 }
  0xb1   : > { %391 = vmatpush1.msra.mxu0 %v336_v8 }
  0xb2   : > { %392 = vmatprep.subr.mxu0 %v335_v23 }
  0xb3   : > { %393 = vmatpush1.msra.mxu0 %v334_v4  ;;  %508 = vmatpush1.xpose.msra.mxu1 %v348_v43 }
  0xb4   : > { %394 = vmatprep.subr.mxu0 %v333_v18  ;;  %509 = vmatprep.subr.mxu1 %v347_v60 }
  0xb5   : > { %395 = vmatpush1.msra.mxu0 %v332_v3 }
  0xb6   : > { %429 = vmatmul.mubr.f32.vlgmr.msra.gmra.mxu0 %v218_v17 }
  0xb7   : > { %434 = vmatprep.mubr.f32.mxu0 %v984_v0  ;;  %510 = vmatpush1.xpose.msra.mxu1 %v346_v37 }
  0xb8   : > { %511 = vmatprep.subr.mxu1 %v345_v54 }
  0xba   : > { %435 = vmatmul.mubr.f32.gmra.mxu0 %v219_v2 }
  0xbb   : > { %512 = vmatpush1.xpose.msra.mxu1 %v344_v31 }
  0xbc   : > { %513 = vmatprep.subr.mxu1 %v343_v48 }
  0xbf   : > { %514 = vmatpush1.xpose.msra.mxu1 %v342_v25 }
  0xc0   : > { %515 = vmatprep.subr.mxu1 %v341_v42 }
  0xc3   : > { %516 = vmatpush1.xpose.msra.mxu1 %v340_v16  ;;  %v220_v16 = vld [vmem:[#allocation7] sm:$0xff] }
  0xc4   : > { %517 = vmatprep.subr.mxu1 %v339_v36 }
  0xc7   : > { %518 = vmatpush1.xpose.msra.mxu1 %v338_v11  ;;  %v221_v11 = vld [vmem:[#allocation7 + $0x8] sm:$0xff] }
  0xc8   : > { %519 = vmatprep.subr.mxu1 %v337_v30 }
  0xcb   : > { %520 = vmatpush1.xpose.msra.mxu1 %v336_v8 }
  0xcc   : > { %521 = vmatprep.subr.mxu1 %v335_v23 }
  0xcf   : > { %522 = vmatpush1.xpose.msra.mxu1 %v334_v4 }
  0xd0   : > { %523 = vmatprep.subr.mxu1 %v333_v18 }
  0xd3   : > { %524 = vmatpush1.xpose.msra.mxu1 %v332_v3 }
 0x176   : > { %v430_v1 = vpop.f32.mrf.mxu0 }
 0x178   : > { %v432_v14 = vpop.f32.mrf.mxu0 }
 0x17a   : > { %v436_v0 = vpop.f32.mrf.mxu0 }
 0x17b   : > { %v441_v15 = vmax.f32 %v430_v1, %v436_v0 }
 0x17c   : > { %v438_v35 = vpop.f32.mrf.mxu0 }
 0x17d   : > { %v442_v40 = vrot.slane %v441_v15, 4  ;;  %v448_v41 = vmax.f32 %v432_v14, %v438_v35 }
 0x17f   : > { %v443_v44 = vmax.f32 %v441_v15, %v442_v40  ;;  %v449_v45 = vrot.slane %v448_v41, 4 }
 0x181   : > { %v444_v46 = vrot.slane %v443_v44, 2  ;;  %v450_v47 = vmax.f32 %v448_v41, %v449_v45 }
 0x183   : > { %v445_v50 = vmax.f32 %v443_v44, %v444_v46  ;;  %v451_v51 = vrot.slane %v450_v47, 2 }
 0x185   : > { %v446_v52 = vrot.slane %v445_v50, 1  ;;  %v452_v53 = vmax.f32 %v450_v47, %v451_v51 }
 0x187   : > { %v447_v56 = vmax.f32 %v445_v50, %v446_v52  ;;  %v453_v57 = vrot.slane %v452_v53, 1 }
 0x189   : > { %v455_v58 = vsub.f32 %v430_v1, %v447_v56  ;;  %v457_v59 = vsub.f32 %v436_v0, %v447_v56  ;;  %v454_v62 = vmax.f32 %v452_v53, %v453_v57 }
 0x18b   : > { %v459_v63 = vmul.f32 1.442695, %v455_v58  ;;  %v463_v5 = vmul.f32 1.442695, %v457_v59  ;;  %v456_v6 = vsub.f32 %v432_v14, %v454_v62  ;;  %v458_v10 = vsub.f32 %v438_v35, %v454_v62 }
 0x18d   : > { %809 = vpow2.f32 %v459_v63  ;;  %v461_v12 = vmul.f32 1.442695, %v456_v6  ;;  %v465_v13 = vmul.f32 1.442695, %v458_v10 }
 0x18e   : > { %811 = vpow2.f32 %v463_v5 }
 0x18f   : > { %813 = vpow2.f32 %v461_v12 }
 0x190   : > { %815 = vpow2.f32 %v465_v13 }
 0x19a   : > { %v810_v19 = vpop.eup %809 }
 0x19b   : > { %v812_v22 = vpop.eup %811 }
 0x19c   : > { %v814_v24 = vpop.eup %813  ;;  %v467_v26 = vadd.f32 %v812_v22, %v810_v19 }
 0x19d   : > { %v816_v27 = vpop.eup %815 }
 0x19e   : > { %v468_v29 = vrot.slane %v467_v26, 4  ;;  %v474_v32 = vadd.f32 %v816_v27, %v814_v24 }
 0x1a0   : > { %v469_v33 = vadd.f32 %v468_v29, %v467_v26  ;;  %v475_v34 = vrot.slane %v474_v32, 4 }
 0x1a2   : > { %v470_v38 = vrot.slane %v469_v33, 2  ;;  %v476_v39 = vadd.f32 %v475_v34, %v474_v32 }
 0x1a4   : > { %v477_v21 = vrot.slane %v476_v39, 2  ;;  %v471_v9 = vadd.f32 %v470_v38, %v469_v33 }
 0x1a6   : > { %v478_v61 = vadd.f32 %v477_v21, %v476_v39  ;;  %v472_v28 = vrot.slane %v471_v9, 1 }
 0x1a8   : > { %v479_v55 = vrot.slane %v478_v61, 1  ;;  %v473_v20 = vadd.f32 %v472_v28, %v471_v9 }
 0x1aa   : > { %v480_v49 = vadd.f32 %v479_v55, %v478_v61  ;;  %817 = vrcp.f32 %v473_v20 }
 0x1ac   : > { %819 = vrcp.f32 %v480_v49 }
 0x1b7   : > { %v818_v7 = vpop.eup %817 }
 0x1b8   : > { %v482_v37 = vmul.f32 %v818_v7, %v810_v19  ;;  %v485_v48 = vmul.f32 %v818_v7, %v812_v22 }
 0x1b9   : > { %v820_v43 = vpop.eup %819 }
 0x1ba   : > { %v484_v60 = vmul.f32 %v820_v43, %v814_v24  ;;  %v486_v54 = vmul.f32 %v820_v43, %v816_v27 }
 0x1bc   : > { %557 = vmatprep.mubr.f32.mxu1 %v484_v60  ;;  %v487_v31 = vadd.f32 %v484_v60, %v482_v37  ;;  %v490_v25 = vadd.f32 %v486_v54, %v485_v48 }
 0x1bd   : > { %558 = vmatmul.mubr.f32.vlgmr.msra.gmra.mxu1 %v482_v37 }
 0x1be   : > { %562 = vmatprep.mubr.f32.mxu1 %v486_v54  ;;  %488 = vadd.xlane.f32.xlu0 %v487_v31 }
 0x1c1   : > { %563 = vmatmul.mubr.f32.gmra.mxu1 %v485_v48 }
 0x1c2   : > { %491 = vadd.xlane.f32.xlu0 %v490_v25 }
 0x247   : > { %v489_v42 = vpop.xlane.xlu0 %488 }
 0x248   : > { %v568_v36 = vmul.f32 %v489_v42, %v220_v16 }
 0x24b   : > { %v492_v30 = vpop.xlane.xlu0 %491 }
 0x24c   : > { %v569_v18 = vmul.f32 %v492_v30, %v221_v11 }
 0x27d   : > { %v559_v8 = vpop.f32.mrf.mxu1 }
 0x27e   : > { %v570_v23 = vsub.f32 %v559_v8, %v568_v36 }
 0x27f   : > { %v561_v4 = vpop.f32.mrf.mxu1 }
 0x280   : > { %v572_v3 = vmul.f32 %v570_v23, %v570_v23 }
 0x281   : > { %v564_v17 = vpop.f32.mrf.mxu1 }
 0x282   : > { %v571_v2 = vsub.f32 %v564_v17, %v569_v18  ;;  %574 = vadd.xlane.f32.xlu1 %v572_v3 }
 0x283   : > { %v566_v1 = vpop.f32.mrf.mxu1 }
 0x284   : > { %v573_v14 = vmul.f32 %v571_v2, %v571_v2 }
 0x286   : > { %576 = vadd.xlane.f32.xlu1 %v573_v14 }
 0x30b   : > { %v575_v0 = vpop.xlane.xlu1 %574 }
 0x30c   : > { %v578_v15 = vmax.f32 %v575_v0, 1e-24 }
 0x30e   : > { %821 = vrsqrt.f32 %v578_v15 }
 0x30f   : > { %v577_v35 = vpop.xlane.xlu1 %576 }
 0x310   : > { %v579_v40 = vmax.f32 %v577_v35, 1e-24 }
 0x312   : > { %823 = vrsqrt.f32 %v579_v40 }
 0x31b   : > { %v822_v41 = vpop.eup %821 }
 0x31c   : > { %v582_v44 = vmul.f32 %v822_v41, %v570_v23 }
 0x31e   : > { %v584_v47 = vmul.f32 %v582_v44, %v582_v44 }
 0x31f   : > { %v824_v45 = vpop.eup %823 }
 0x320   : > { %v583_v46 = vmul.f32 %v824_v45, %v571_v2 }
 0x322   : > { %v585_v50 = vmul.f32 %v583_v46, %v583_v46 }
 0x324   : > { %v586_v51 = vadd.f32 %v585_v50, %v584_v47 }
 0x326   : > { %587 = vadd.xlane.f32.xlu0 %v586_v51 }
 0x3af   : > { %v588_v52 = vpop.xlane.xlu0 %587 }
 0x3b0   : > { %v589_v53 = vrot.slane %v588_v52, 4 }
 0x3b2   : > { %v590_v56 = vadd.f32 %v589_v53, %v588_v52 }
 0x3b4   : > { %v591_v57 = vrot.slane %v590_v56, 2 }
 0x3b6   : > { %v592_v58 = vadd.f32 %v591_v57, %v590_v56 }
 0x3b8   : > { %v593_v59 = vrot.slane %v592_v58, 1 }
 0x3ba   : > { %v594_v62 = vadd.f32 %v593_v59, %v592_v58 }
 0x3bc   : > { %729 = vpush %v594_v62 }
 0x3ed   : > { %s730_s18 = spop %729 }
 0x3ee   : > { %v596_v63 = vstv %s730_s18 }
 0x3ef   : > { %v597_v5 = vmax.f32 %v596_v63, 1e-24 }
 0x3f1   : > { %825 = vrsqrt.f32 %v597_v5 }
 0x3fe   : > { %v826_v6 = vpop.eup %825 }
 0x3ff   : > { %v599_v10 = vmul.f32 %v826_v6, %v582_v44  ;;  %v600_v12 = vmul.f32 %v826_v6, %v583_v46 }
 0x401   : > { %601 = vst [vmem:[%s217_s27] sm:$0xff] %v599_v10  ;;  %602 = vst [vmem:[%s217_s27 + $0x8] sm:$0xff] %v600_v12 }
 0x402   : > { %920 = shalt.err (!%p917_p9)
}
 0x403   : > { %s921_s24 = scalar_lea.hbm %s1348_s9, 256  ;;  %s925_s5 = scalar_lea.hbm %s1395_s3, 1024 }
 0x404   : > { %p922_p12 = scmp.ne.s32.totalorder %s1348_s9, %s921_s24  ;;  %p926_p4 = scmp.lt.s32.totalorder %s1348_s9, %s1395_s3 }
 0x405   : > { %p927_p8 = scmp.lt.s32.totalorder %s925_s5, %s921_s24 }
 0x406   : > { %p923_p3 = pnand %p922_p12, %p1411_p0 }
 0x407   : > { %p928_p5 = por %p927_p8, %p926_p4 }
 0x408   : > { %p924_p13 = pneg %p923_p3 }
 0x40a   : > { %p929_p10 = pnand %p928_p5, %p924_p13 }
 0x40c   : > { %932 = shalt.err (!%p929_p10)
}
 0x40d   : > { %s986_s20 = smov 128   ;;  %s987_s25 = smov 8  }
 0x40e   : > { %741 = dma.vmem_to_hbm [thread:$0]  (%p1411_p0), %s1350_s28, 256, %s1348_s9, %s604_s17, %s986_s20, %s986_s20, %s987_s25  }
 0x40f PF: > { %p763_p1 = scmp.ge.s32.totalorder %s975_s15, 2  ;;  %s632_s27 = sand.u32 1, %s963_s12  }
 0x410   : > { %p1412_p2 = scmp.ne.s32.totalorder %s1401_s19, 0  ;;  %s633_s29 = scalar_lea.sflag [#allocation4], %s632_s27 }
 0x412   : > { %p755_p6 = pnand %p763_p1, %p1412_p2 }
 0x414   : > { %p756_p11 = pneg %p755_p6 }
 0x416   : > { %958 = dma.done.wait (%p756_p11), %s633_s29, 256  }
 0x417   : > { %960 = vsyncadd (%p756_p11), %s633_s29, 4294967040  ;;  %p17_p7 = scmp.ge.s32.totalorder %s1079_s7, 6   ;;  %s1413_s12 = smov %s967_s13 }
 0x418   : > { %s1414_s13 = smov %s971_s14  ;;  %s1415_s14 = smov %s1095_s11 }
 0x419   : > { %s1416_s15 = smov %s1079_s7  ;;  %19 = sbr.rel (!%p17_p7) target bundleno = 6 (0x6), region = 85 }
 0x41e   :  { %638 = vsyncpa [#allocation3], 1 }
 0x41f   :  { %640 = vsyncpa [#allocation3 + $0x1], 1 }
 0x420   :  { %641 = vsyncpa [#allocation6], 1 }
 0x421   :  { %642 = vsyncpa [#allocation4], 1 }
 0x422   :  { %644 = vsyncpa [#allocation4 + $0x1], 1 }

</bundles_post_ra>
